<compile_context>
chip_gen: v6e
topology: v6e:2x2x1
jax: 0.10.0
libtpu: 0.0.40
codegen_flags: <defaults>
</compile_context>

<pallas_src>
import jax
import jax.numpy as jnp
from jax.experimental import pallas as pl
from jax.experimental.pallas import tpu as pltpu


# ----------------------------------------------------------------------------
# Kernel: tiled masked mean-pool (MXU contraction) + linear reward head
# ----------------------------------------------------------------------------
def reward_forward_kernel(len_ref, h_ref, w_ref, b_ref, raw_ref, acc_ref):
    """len_ref : (TB, 1)  int32   valid-token count per row (prefix lengths)
       h_ref   : (TB, TS, H)      hidden-state tile (bf16 on the wire)
       w_ref   : (H, OP)  bf16    reward-head weight (lane-padded)
       b_ref   : (1, OP)  f32     reward-head bias   (lane-padded)
       raw_ref : (TB, OP) f32     raw rewards (pre-normalization)
       acc_ref : (TB, 1, H) f32   masked sequence-sum accumulator (VMEM)"""
    s_idx = pl.program_id(1)

    @pl.when(s_idx == 0)
    def _init():
        acc_ref[...] = jnp.zeros_like(acc_ref)

    TB, TS, _ = h_ref.shape

    # Build the (TB, 1, TS) validity mask in-kernel from per-row lengths:
    # no mask stream from HBM, padded sequence positions fall out as zeros.
    pos = s_idx * TS + jax.lax.broadcasted_iota(jnp.int32, (TB, 1, TS), 2)
    m = (pos < len_ref[...][:, :, None]).astype(h_ref.dtype)        # (TB,1,TS)

    # Masked sequence-sum on the MXU (bf16 x bf16 -> f32 accumulate).  Keeps
    # the VPU slots free so the kernel stays HBM-bound (critical on v7x).
    acc_ref[...] += jnp.einsum("bqs,bsh->bqh", m, h_ref[...],
                               preferred_element_type=jnp.float32)  # (TB,1,H)

    @pl.when(s_idx == pl.num_programs(1) - 1)
    def _finalize():
        denom = jnp.maximum(len_ref[...].astype(jnp.float32), 1.0)      # (TB,1)
        pooled = (acc_ref[...][:, 0, :] / denom).astype(w_ref.dtype)    # (TB,H)
        raw_ref[...] = (
            jnp.dot(pooled, w_ref[...], preferred_element_type=jnp.float32)
            + b_ref[...])                                               # (TB,OP)


# ----------------------------------------------------------------------------
# Tile sizing against an explicit per-generation VMEM budget
# ----------------------------------------------------------------------------
def _vmem_budget_bytes():
    try:
        cap = int(pltpu.get_tpu_info().vmem_capacity_bytes)
    except Exception:
        cap = 64 * 1024 * 1024          # conservative fallback: v7x per-TC VMEM
    return min(cap * 3 // 4, 100 * 1024 * 1024)


def _choose_tiles(NB, S, H, OP, h_bytes, budget):
    # Batch tile: 8 keeps the (8,128) layout rule and, for NB >= 16, gives >= 2
    # "parallel" batch blocks so both v7x TensorCores get work.
    TB = 8 if NB % 8 == 0 else NB
    S128 = pl.cdiv(S, 128) * 128
    # Resident / double-buffered non-hidden footprint (weights, bias, lengths,
    # accumulator scratch, raw output).
    fixed = (2 * H * OP * 2 + 2 * OP * 4 + 2 * TB * 4
             + TB * H * 4 + 2 * TB * OP * 4)
    # Largest sequence tile (multiple of 128 dividing the padded S) whose
    # double-buffered hidden block fits the budget; ~8 MiB/block is the point
    # of diminishing returns for a mem-bound stream.
    TS = 128
    for ts in range(S128, 0, -128):
        if S128 % ts:
            continue
        blk = TB * ts * H * h_bytes
        if blk <= 8 * 1024 * 1024 and fixed + 2 * blk <= budget:
            TS = ts
            break
    return TB, TS, S128


# ----------------------------------------------------------------------------
# Wrapper
# ----------------------------------------------------------------------------
def reward_forward(hidden_states, attention_mask, w_head, b_head):
    """hidden_states: (NB, S, H) (bf16 kept native), attention_mask: (NB, S),
       w_head: (H, O), b_head: (O,).  Returns (raw, normalized), each (NB, O)."""
    NB, S, H = hidden_states.shape
    O = w_head.shape[1]

    # Per-row valid-token counts.
    # TODO(synk): assumes the attention mask marks a contiguous prefix of valid
    # tokens (standard right-padding); arbitrary hole-y masks would need the
    # mask streamed instead of lengths.
    lengths = jnp.sum(attention_mask.astype(jnp.int32), axis=1,
                      keepdims=True).astype(jnp.int32)              # (NB, 1)

    # Lane-dense padded reward head: bf16 weight (MXU-native), f32 bias.
    OP = max(128, pl.cdiv(O, 128) * 128)
    w_p = jnp.zeros((H, OP), jnp.bfloat16).at[:, :O].set(
        w_head.astype(jnp.bfloat16))
    b_p = jnp.zeros((1, OP), jnp.float32).at[:, :O].set(
        b_head.reshape(1, O).astype(jnp.float32))

    h_bytes = jnp.dtype(hidden_states.dtype).itemsize
    budget = _vmem_budget_bytes()
    TB, TS, S_pad = _choose_tiles(NB, S, H, OP, h_bytes, budget)
    if S_pad != S:   # zero-pad sequence; padded positions are masked by lengths
        hidden_states = jnp.pad(hidden_states,
                                ((0, 0), (0, S_pad - S), (0, 0)))

    grid = (NB // TB, S_pad // TS)

    raw_p = pl.pallas_call(
        reward_forward_kernel,
        out_shape=jax.ShapeDtypeStruct((NB, OP), jnp.float32),
        grid_spec=pltpu.PrefetchScalarGridSpec(
            num_scalar_prefetch=0,
            grid=grid,
            in_specs=[
                pl.BlockSpec((TB, 1), lambda b, s: (b, 0)),          # lengths
                pl.BlockSpec((TB, TS, H), lambda b, s: (b, s, 0)),   # hidden
                pl.BlockSpec((H, OP), lambda b, s: (0, 0)),          # head W
                pl.BlockSpec((1, OP), lambda b, s: (0, 0)),          # head b
            ],
            out_specs=pl.BlockSpec((TB, OP), lambda b, s: (b, 0)),   # raw
            scratch_shapes=[pltpu.VMEM((TB, 1, H), jnp.float32)],    # acc
        ),
        compiler_params=pltpu.CompilerParams(
            dimension_semantics=("parallel", "arbitrary"),
            vmem_limit_bytes=int(budget)),
    )(lengths, hidden_states, w_p, b_p)

    raw = raw_p[:, :O]
    normalized = jax.nn.sigmoid(raw)   # normalize_reward() for RewardType.SCALAR
    return raw, normalized


# ----------------------------------------------------------------------------
# Scalar preference loss: tiny -> plain JAX (stable softplus form)
#   -log(sigmoid(x)) == softplus(-x)
# ----------------------------------------------------------------------------
def compute_scalar_preference_loss(chosen, rejected, margin=0.0):
    diff = chosen.astype(jnp.float32) - rejected.astype(jnp.float32) - margin
    return jnp.mean(jax.nn.softplus(-diff))


# ----------------------------------------------------------------------------
# Glue: deterministic parameter init + toy "encoder" (abstract in reference)
# ----------------------------------------------------------------------------
def init_params(key, vocab_size, hidden_size, num_objectives):
    k_emb, k_w, k_b = jax.random.split(key, 3)
    embedding = (jax.random.normal(k_emb, (vocab_size, hidden_size),
                                   dtype=jnp.float32) * 0.02).astype(jnp.bfloat16)
    # Round the head weight to bf16 (kernel-resident precision) up front.
    w_head = (jax.random.normal(k_w, (hidden_size, num_objectives),
                                dtype=jnp.float32) * 0.02
              ).astype(jnp.bfloat16).astype(jnp.float32)
    b_head = jax.random.normal(k_b, (num_objectives,), dtype=jnp.float32) * 0.1
    return embedding, w_head, b_head


def encode_sequence(embedding, input_ids):
    # simple deterministic embedding lookup standing in for the backbone
    return jnp.take(embedding, input_ids, axis=0)  # (NB, S, H) bf16


if __name__ == "__main__":
    key = jax.random.PRNGKey(0)
    # batch (per side), seq, hidden, num_objectives, vocab
    B, S, H, O, V = 2, 256, 128, 1, 64

    k_params, k_ids_c, k_ids_r = jax.random.split(key, 3)
    embedding, w_head, b_head = init_params(k_params, V, H, O)

    # chosen / rejected batches fused along the batch axis -> one pallas_call
    chosen_ids = jax.random.randint(k_ids_c, (B, S), 0, V)
    rejected_ids = jax.random.randint(k_ids_r, (B, S), 0, V)
    ids_all = jnp.concatenate([chosen_ids, rejected_ids], axis=0)      # (2B, S)

    # variable-length attention masks (trailing padding)
    lengths = jnp.array([S - 5, S - 17, S, S - 63], dtype=jnp.int32)   # (2B,)
    mask_all = (jnp.arange(S)[None, :] < lengths[:, None]).astype(jnp.float32)

    h_all = encode_sequence(embedding, ids_all)                        # bf16

    raw_all, norm_all = reward_forward(h_all, mask_all, w_head, b_head)
    raw_c, raw_r = raw_all[:B], raw_all[B:]
    loss = compute_scalar_preference_loss(raw_c, raw_r, margin=0.0)

    jax.block_until_ready((raw_all, norm_all, loss))

    # pure-JAX reference (same bf16 activations/weights, f32 math)
    def ref_forward(h_bf16, m):
        h32 = h_bf16.astype(jnp.float32)
        m32 = m.astype(jnp.float32)
        pooled = (h32 * m32[:, :, None]).sum(1) / jnp.maximum(
            m32.sum(1, keepdims=True), 1.0)
        raw = pooled @ w_head + b_head[None, :]
        return raw, jax.nn.sigmoid(raw)

    rr_all, rn_all = ref_forward(h_all, mask_all)
    ref_loss = jnp.mean(jax.nn.softplus(-(rr_all[:B] - rr_all[B:])))

    assert jnp.allclose(raw_all, rr_all, atol=2e-3, rtol=2e-2)
    assert jnp.allclose(norm_all, rn_all, atol=2e-3, rtol=2e-2)
    assert jnp.allclose(loss, ref_loss, atol=2e-3, rtol=2e-2)

    print("KERNEL_OK")
</pallas_src>

<mosaic_0001>
module attributes {stable_mosaic.version = 11 : i64} {
  func.func @reward_forward_kernel(%arg0: i32, %arg1: i32, %arg2: memref<4x1xi32, #tpu.memory_space<vmem>>, %arg3: memref<4x256x128xbf16, #tpu.memory_space<vmem>>, %arg4: memref<128x128xbf16, #tpu.memory_space<vmem>>, %arg5: memref<1x128xf32, #tpu.memory_space<vmem>>, %arg6: memref<4x128xf32, #tpu.memory_space<vmem>>, %arg7: memref<4x1x128xf32, #tpu.memory_space<vmem>>) attributes {dimension_semantics = [#tpu.dimension_semantics<parallel>, #tpu.dimension_semantics<arbitrary>], iteration_bounds = array<i64: 1, 1>, scalar_prefetch = 0 : i64, scratch_operands = 1 : i64, tpu.core_type = #tpu.core_type<tc>, window_params = [{transform_indices = @transform_0, window_bounds = array<i64: 4, 1>}, {transform_indices = @transform_1, window_bounds = array<i64: 4, 256, 128>}, {pipeline_mode = #tpu.pipeline_mode<synchronous>, transform_indices = @transform_2, window_bounds = array<i64: 128, 128>}, {pipeline_mode = #tpu.pipeline_mode<synchronous>, transform_indices = @transform_3, window_bounds = array<i64: 1, 128>}, {transform_indices = @transform_4, window_bounds = array<i64: 4, 128>}]} {
    %c0_i32 = arith.constant 0 : i32
    %0 = arith.cmpi eq, %arg1, %c0_i32 : i32
    %1 = arith.extui %0 : i1 to i32
    %c0_i32_0 = arith.constant 0 : i32
    %2 = arith.cmpi ne, %1, %c0_i32_0 : i32
    scf.if %2 {
      %cst_13 = arith.constant 0.000000e+00 : f32
      %22 = vector.broadcast %cst_13 : f32 to vector<4x1x128xf32>
      %c0_14 = arith.constant 0 : index
      %c0_15 = arith.constant 0 : index
      %c0_16 = arith.constant 0 : index
      %23 = vector.load %arg7[%c0_14, %c0_15, %c0_16] : memref<4x1x128xf32, #tpu.memory_space<vmem>>, vector<4x1x128xf32>
      tpu.vector_store %arg7[%c0_14, %c0_15, %c0_16], %22 {strides = array<i32>} : memref<4x1x128xf32, #tpu.memory_space<vmem>>, vector<4x1x128xf32>,
    } else {
    }
    %c256_i32 = arith.constant 256 : i32
    %3 = arith.muli %arg1, %c256_i32 : i32
    %4 = tpu.iota {dimensions = array<i32: 2>} : vector<4x1x256xi32>
    %5 = vector.broadcast %3 : i32 to vector<4x1x256xi32>
    %6 = arith.addi %5, %4 : vector<4x1x256xi32>
    %c0 = arith.constant 0 : index
    %c0_1 = arith.constant 0 : index
    %7 = vector.load %arg2[%c0, %c0_1] : memref<4x1xi32, #tpu.memory_space<vmem>>, vector<4x1xi32>
    %8 = vector.shape_cast %7 : vector<4x1xi32> to vector<4x1x1xi32>
    %9 = vector.broadcast %8 : vector<4x1x1xi32> to vector<4x1x256xi32>
    %10 = arith.cmpi slt, %6, %9 : vector<4x1x256xi32>
    %11 = arith.extui %10 : vector<4x1x256xi1> to vector<4x1x256xi32>
    %12 = arith.sitofp %11 : vector<4x1x256xi32> to vector<4x1x256xf32>
    %13 = arith.truncf %12 : vector<4x1x256xf32> to vector<4x1x256xbf16>
    %c0_2 = arith.constant 0 : index
    %c0_3 = arith.constant 0 : index
    %c0_4 = arith.constant 0 : index
    %14 = vector.load %arg7[%c0_2, %c0_3, %c0_4] : memref<4x1x128xf32, #tpu.memory_space<vmem>>, vector<4x1x128xf32>
    %c0_5 = arith.constant 0 : index
    %c0_6 = arith.constant 0 : index
    %c0_7 = arith.constant 0 : index
    %15 = vector.load %arg3[%c0_5, %c0_6, %c0_7] : memref<4x256x128xbf16, #tpu.memory_space<vmem>>, vector<4x256x128xbf16>
    "tpu.trace_start"() <{level = 10 : i32, message = "bqs,bsh->bqh"}> : () -> ()
    %cst = arith.constant dense<0.000000e+00> : vector<4x1x128xf32>
    %16 = tpu.matmul %13, %15, %cst {dimension_numbers = #tpu.dot_dimension_numbers<[2], [1], [1], [2], [0, 0, 0, 1, 1, 2], [0], [0]>} : vector<4x1x256xbf16>, vector<4x256x128xbf16>, vector<4x1x128xf32> -> vector<4x1x128xf32>
    "tpu.trace_stop"() : () -> ()
    %17 = arith.addf %14, %16 : vector<4x1x128xf32>
    %c0_8 = arith.constant 0 : index
    %c0_9 = arith.constant 0 : index
    %c0_10 = arith.constant 0 : index
    %18 = vector.load %arg7[%c0_8, %c0_9, %c0_10] : memref<4x1x128xf32, #tpu.memory_space<vmem>>, vector<4x1x128xf32>
    tpu.vector_store %arg7[%c0_8, %c0_9, %c0_10], %17 {strides = array<i32>} : memref<4x1x128xf32, #tpu.memory_space<vmem>>, vector<4x1x128xf32>,
    %c0_i32_11 = arith.constant 0 : i32
    %19 = arith.cmpi eq, %arg1, %c0_i32_11 : i32
    %20 = arith.extui %19 : i1 to i32
    %c0_i32_12 = arith.constant 0 : i32
    %21 = arith.cmpi ne, %20, %c0_i32_12 : i32
    scf.if %21 {
      %c0_13 = arith.constant 0 : index
      %c0_14 = arith.constant 0 : index
      %22 = vector.load %arg2[%c0_13, %c0_14] : memref<4x1xi32, #tpu.memory_space<vmem>>, vector<4x1xi32>
      %23 = arith.sitofp %22 : vector<4x1xi32> to vector<4x1xf32>
      %cst_15 = arith.constant 1.000000e+00 : f32
      %24 = vector.broadcast %cst_15 : f32 to vector<4x1xf32>
      %25 = arith.maximumf %23, %24 : vector<4x1xf32>
      %c0_16 = arith.constant 0 : index
      %c0_17 = arith.constant 0 : index
      %c0_18 = arith.constant 0 : index
      %26 = vector.load %arg7[%c0_16, %c0_17, %c0_18] : memref<4x1x128xf32, #tpu.memory_space<vmem>>, vector<4x1x128xf32>
      %27 = vector.shape_cast %26 : vector<4x1x128xf32> to vector<4x128xf32>
      %28 = vector.broadcast %25 : vector<4x1xf32> to vector<4x128xf32>
      %29 = arith.divf %27, %28 : vector<4x128xf32>
      %30 = arith.truncf %29 : vector<4x128xf32> to vector<4x128xbf16>
      %c0_19 = arith.constant 0 : index
      %c0_20 = arith.constant 0 : index
      %31 = vector.load %arg4[%c0_19, %c0_20] : memref<128x128xbf16, #tpu.memory_space<vmem>>, vector<128x128xbf16>
      %cst_21 = arith.constant dense<0.000000e+00> : vector<4x128xf32>
      %32 = tpu.matmul %30, %31, %cst_21 {dimension_numbers = #tpu.dot_dimension_numbers<[1], [0], [0], [1], [0, 0, 1, 1], [], []>} : vector<4x128xbf16>, vector<128x128xbf16>, vector<4x128xf32> -> vector<4x128xf32>
      %c0_22 = arith.constant 0 : index
      %c0_23 = arith.constant 0 : index
      %33 = vector.load %arg5[%c0_22, %c0_23] : memref<1x128xf32, #tpu.memory_space<vmem>>, vector<1x128xf32>
      %34 = vector.broadcast %33 : vector<1x128xf32> to vector<4x128xf32>
      %35 = arith.addf %32, %34 : vector<4x128xf32>
      %c0_24 = arith.constant 0 : index
      %c0_25 = arith.constant 0 : index
      %36 = vector.load %arg6[%c0_24, %c0_25] : memref<4x128xf32, #tpu.memory_space<vmem>>, vector<4x128xf32>
      tpu.vector_store %arg6[%c0_24, %c0_25], %35 {strides = array<i32>} : memref<4x128xf32, #tpu.memory_space<vmem>>, vector<4x128xf32>,
    } else {
    }
    return
  }
  func.func @transform_0(%arg0: i32, %arg1: i32) -> (i32, i32) {
    %c0_i32 = arith.constant 0 : i32
    %c0_i32_0 = arith.constant 0 : i32
    return %arg0, %c0_i32 : i32, i32
  }
  func.func @transform_1(%arg0: i32, %arg1: i32) -> (i32, i32, i32) {
    %c0_i32 = arith.constant 0 : i32
    %c0_i32_0 = arith.constant 0 : i32
    return %arg0, %arg1, %c0_i32 : i32, i32, i32
  }
  func.func @transform_2(%arg0: i32, %arg1: i32) -> (i32, i32) {
    %c0_i32 = arith.constant 0 : i32
    %c0_i32_0 = arith.constant 0 : i32
    %c0_i32_1 = arith.constant 0 : i32
    return %c0_i32, %c0_i32_0 : i32, i32
  }
  func.func @transform_3(%arg0: i32, %arg1: i32) -> (i32, i32) {
    %c0_i32 = arith.constant 0 : i32
    %c0_i32_0 = arith.constant 0 : i32
    %c0_i32_1 = arith.constant 0 : i32
    return %c0_i32, %c0_i32_0 : i32, i32
  }
  func.func @transform_4(%arg0: i32, %arg1: i32) -> (i32, i32) {
    %c0_i32 = arith.constant 0 : i32
    %c0_i32_0 = arith.constant 0 : i32
    return %arg0, %c0_i32 : i32, i32
  }
}

</mosaic_0001>

<bundles_post_ra>
// kernel: tpu_custom_call.1
= control target key start
LH: loop header
LB: loop body
LE: loop exit
PB: predicated region body
PF: predicated region fallthrough
CT: control target
= control target key end

     0   :  { %9 = vsyncpa [#allocation4], 0  ;;  %s1497_s0 = inlined_call_operand.vmem [shape: s32[4,1], index: 0, kind: input, shape index: {}]   ;;  %s1498_s1 = inlined_call_operand.hbm [shape: bf16[4,256,128], index: 1, kind: input, shape index: {}]   ;;  %s1499_s2 = inlined_call_operand.hbm [shape: bf16[128,128], index: 2, kind: input, shape index: {}]   ;;  %s1500_s3 = inlined_call_operand.vmem [shape: f32[1,128], index: 3, kind: input, shape index: {}]   ;;  %s1501_s4 = inlined_call_operand.hbm [shape: f32[4,128], index: 4, kind: output, shape index: {}]  }
   0x1   :  { %10 = vsyncpa [#allocation7], 0 }
   0x2   :  { %11 = vsyncpa [#allocation5], 0  ;;  %s1397_s15 = smov [#allocation3]  }
   0x3   :  { %s19_s16 = sshll.u32 %s1397_s15, 4  ;;  %s20_s16 = int_to_ptr.vmem [resolvable:$true] %s19_s16 }
   0x4   :  { %s1339_s17 = scalar_lea.vmem %s20_s16, 8192  ;;  %p1344_p1 = scmp.lt.s32.totalorder %s20_s16, %s20_s16 }
   0x5   :  { %p1340_p0 = scmp.ne.s32.totalorder %s20_s16, %s1339_s17  ;;  %p1345_p2 = scmp.lt.s32.totalorder %s1339_s17, %s1339_s17 }
   0x7   :  { %p1346_p3 = por %p1345_p2, %p1344_p1 }
   0x9   :  { %p1347_p4 = pnand %p1346_p3, %p1340_p0 }
   0xb   :  { %1350 = shalt.err (!%p1347_p4)
}
   0xc   :  { %s1398_s18 = smov 64   ;;  %s1399_s19 = smov 4  }
   0xd   :  { %25 = dma.hbm_to_vmem [thread:$0]  %s1498_s1, 8192, %s20_s16, [#allocation4], %s1398_s18, %s1398_s18, %s1399_s19  }
   0xe   :  { %s1400_s22 = smov [#allocation6]  }
   0xf   :  { %s31_s23 = sshll.u32 %s1400_s22, 4  ;;  %s32_s23 = int_to_ptr.vmem [resolvable:$true] %s31_s23 }
  0x10   :  { %s1359_s24 = scalar_lea.vmem %s32_s23, 1024  ;;  %p1364_p6 = scmp.lt.s32.totalorder %s32_s23, %s32_s23 }
  0x11   :  { %p1360_p5 = scmp.ne.s32.totalorder %s32_s23, %s1359_s24  ;;  %p1365_p7 = scmp.lt.s32.totalorder %s1359_s24, %s1359_s24 }
  0x13   :  { %p1366_p8 = por %p1365_p7, %p1364_p6 }
  0x15   :  { %p1367_p9 = pnand %p1366_p8, %p1360_p5 }
  0x17   :  { %1370 = shalt.err (!%p1367_p9)
}
  0x18   :  { %37 = dma.hbm_to_vmem [thread:$0]  %s1499_s2, 1024, %s32_s23, [#allocation7], %s1398_s18, %s1398_s18, %s1399_s19  }
  0x19   :  { %1391 = dma.done.wait [#allocation4], 8192  }
  0x1a   :  { %1392 = vsyncadd [#allocation4], 4294959104 }
  0x1b   :  { %1393 = dma.done.wait [#allocation7], 1024  }
  0x1c   :  { %1394 = vsyncadd [#allocation7], 4294966272  ;;  %v56_v0 = vlaneseq  ;;  %v1401_v1 = vmov 0   ;;  %v1402_v2 = vmov 1966171168   ;;  %v1251_v11 = vld [vmem:[#allocation3 + $0x78] sm:$0xff]  }
  0x1d   :  { %1249 = vset.pattern.permute.xlu0 %v1401_v1  ;;  %v72_v3 = vunpack.c.l.s4 %v1402_v2  ;;  %1250 = vset.pattern.permute.xlu1 %v1401_v1  ;;  %v1024_v7 = vld.sshfl [vmem:[%s1497_s0] sm:$0x33 pattern:$0x75316420]  ;;  %v1253_v16 = vld [vmem:[#allocation3 + $0x70] sm:$0xff]   ;;  %v1257_v22 = vld [vmem:[#allocation3 + $0x68] sm:$0xff]  }
  0x1e   :  { %v1439_v4 = vshrl.u32 %v56_v0, 7  ;;  %v834_v8 = vld [vmem:[%s1497_s0] sm:$0xf]  ;;  %v70_v10 = vcombine.high %v1024_v7, %v1024_v7  ;;  %1122 = vmatprep.subr.bf16.mxu0 %v1251_v11  ;;  %v1255_v19 = vld [vmem:[#allocation3 + $0x30] sm:$0xff]   ;;  %v1259_v24 = vld [vmem:[#allocation3 + $0x28] sm:$0xff]   ;;  %v1449_v50 = vand.u32 127, %v56_v0 }
  0x1f   :  { %v73_v5 = vunpack.c.0.s8 %v72_v3  ;;  %v1252_v12 = vld [vmem:[#allocation3 + $0x38] sm:$0xff]   ;;  %v835_v14 = vcvt.s32.f32 %v834_v8  ;;  %v1258_v23 = vld [vmem:[#allocation3 + $0xf0] sm:$0xff]   ;;  %v1261_v26 = vld [vmem:[#allocation3 + $0x60] sm:$0xff]   ;;  %v1403_v61 = vmov 1.0|1.0   ;;  %s1406_s30 = smov [#allocation8]  }
  0x20   :  { %1123 = vmatpush3.bf16.msra.mxu0 %v1252_v12  ;;  %v1254_v17 = vld [vmem:[#allocation3 + $0xf8] sm:$0xff]   ;;  %v1260_v25 = vld [vmem:[#allocation3 + $0xb0] sm:$0xff]   ;;  %v1262_v27 = vld [vmem:[#allocation3 + $0xe8] sm:$0xff]   ;;  %v1452_v51 = vsub.s32 0, %v1439_v4  ;;  %v58_v52 = vadd.s32 128, %v1449_v50  ;;  %s1014_s5 = sshll.u32 %s1406_s30, 4  ;;  %s1015_s5 = int_to_ptr.vmem [resolvable:$true] %s1014_s5 }
  0x21   :  { %v76_v6 = vsub.s32 %v73_v5, %v1439_v4  ;;  %1124 = vmatprep.subr.bf16.mxu0 %v1253_v16  ;;  %1144 = vmatprep.subr.bf16.mxu1 %v1254_v17  ;;  %v1256_v20 = vld [vmem:[#allocation3 + $0xb8] sm:$0xff]   ;;  %v836_v21 = vmax.f32 %v835_v14, 1.0  ;;  %v1263_v28 = vld [vmem:[#allocation3 + $0x20] sm:$0xff]   ;;  %v1264_v29 = vld [vmem:[#allocation3 + $0xa8] sm:$0xff]   ;;  %s1371_s6 = scalar_lea.vmem %s1015_s5, 64  ;;  %p1376_p11 = scmp.lt.s32.totalorder %s1015_s5, %s1015_s5 }
  0x22   :  { %1145 = vmatpush3.bf16.msra.mxu1 %v1256_v20  ;;  %v1265_v30 = vld [vmem:[#allocation3 + $0x58] sm:$0xff]   ;;  %v1266_v31 = vld [vmem:[#allocation3 + $0xe0] sm:$0xff]   ;;  %v1269_v34 = vld [vmem:[#allocation3 + $0x50] sm:$0xff]   ;;  %p1372_p10 = scmp.ne.s32.totalorder %s1015_s5, %s1371_s6  ;;  %p1377_p12 = scmp.lt.s32.totalorder %s1371_s6, %s1371_s6 }
  0x23   :  { %v77_v9 = vrot.slane %v1024_v7, %v76_v6  ;;  %v84_v13 = vrot.slane %v70_v10, %v76_v6  ;;  %1146 = vmatprep.subr.bf16.mxu1 %v1258_v23  ;;  %v1267_v32 = vld [vmem:[#allocation3 + $0x18] sm:$0xff]   ;;  %v1268_v33 = vld [vmem:[#allocation3 + $0xa0] sm:$0xff]   ;;  %v1271_v36 = vld [vmem:[#allocation3 + $0x10] sm:$0xff]  }
  0x24   :  { %1125 = vmatpush3.bf16.msra.mxu0 %v1255_v19  ;;  %v1270_v35 = vld [vmem:[#allocation3 + $0xd8] sm:$0xff]   ;;  %v1273_v38 = vld [vmem:[#allocation3 + $0x48] sm:$0xff]   ;;  %v1274_v39 = vld [vmem:[#allocation3 + $0xd0] sm:$0xff]   ;;  %p1378_p13 = por %p1377_p12, %p1376_p11 }
  0x25   :  { %88 = vperm.xlu0 %1249, %v77_v9   ;;  %v85_v15 = vcombine.high %v77_v9, %v77_v9  ;;  %v86_v18 = vcombine.high %v84_v13, %v84_v13  ;;  %1126 = vmatprep.subr.bf16.mxu0 %v1257_v22  ;;  %v1272_v37 = vld [vmem:[#allocation3 + $0x98] sm:$0xff]   ;;  %v1275_v40 = vld [vmem:[#allocation3 + $0x8] sm:$0xff]   ;;  %v1276_v41 = vld [vmem:[#allocation3 + $0x90] sm:$0xff]  }
  0x26   :  { %1147 = vmatpush3.bf16.msra.mxu1 %v1260_v25  ;;  %v1277_v42 = vld [vmem:[#allocation3 + $0x40] sm:$0xff]   ;;  %v1278_v43 = vld [vmem:[#allocation3 + $0xc8] sm:$0xff]   ;;  %v1282_v47 = vld [vmem:[#allocation3 + $0x178] sm:$0xff]   ;;  %p1379_p0 = pnand %p1378_p13, %p1372_p10 }
  0x27   :  { %102 = vperm.xlu1 %1250, %v85_v15   ;;  %1148 = vmatprep.subr.bf16.mxu1 %v1262_v27  ;;  %v1279_v44 = vld [vmem:[#allocation3] sm:$0xff]   ;;  %v1280_v45 = vld [vmem:[#allocation3 + $0x88] sm:$0xff]   ;;  %v1286_v49 = vld [vmem:[#allocation3 + $0x1f8] sm:$0xff]  }
  0x28   :  { %1127 = vmatpush3.bf16.msra.mxu0 %v1259_v24  ;;  %v1281_v46 = vld [vmem:[#allocation3 + $0xc0] sm:$0xff]   ;;  %v1284_v58 = vld [vmem:[#allocation3 + $0x138] sm:$0xff]   ;;  %v1285_v60 = vld [vmem:[#allocation3 + $0x170] sm:$0xff]  }
  0x29   :  { %95 = vperm.xlu0 %1249, %v84_v13   ;;  %1128 = vmatprep.subr.bf16.mxu0 %v1261_v26  ;;  %v1283_v48 = vld [vmem:[#allocation3 + $0x80] sm:$0xff]   ;;  %v1287_v0 = vld [vmem:[#allocation3 + $0x130] sm:$0xff]   ;;  %v1288_v1 = vld [vmem:[#allocation3 + $0x1b8] sm:$0xff]  }
  0x2a   :  { %1149 = vmatpush3.bf16.msra.mxu1 %v1264_v29  ;;  %v1289_v2 = vld [vmem:[#allocation3 + $0x168] sm:$0xff]   ;;  %v1290_v3 = vld [vmem:[#allocation3 + $0x1f0] sm:$0xff]   ;;  %v1293_v7 = vld [vmem:[#allocation3 + $0x160] sm:$0xff]   ;;  %v1404_v29 = vmov 0.0  }
  0x2b   :  { %109 = vperm.xlu1 %1250, %v86_v18   ;;  %1150 = vmatprep.subr.bf16.mxu1 %v1266_v31  ;;  %v1291_v5 = vld [vmem:[#allocation3 + $0x128] sm:$0xff]   ;;  %v1292_v6 = vld [vmem:[#allocation3 + $0x1b0] sm:$0xff]   ;;  %v1295_v9 = vld [vmem:[#allocation3 + $0x120] sm:$0xff]   ;;  %51 = vst [vmem:[#allocation2] sm:$0x1] %v1404_v29 }
  0x2c   :  { %1129 = vmatpush3.bf16.msra.mxu0 %v1263_v28  ;;  %v1294_v8 = vld [vmem:[#allocation3 + $0x1e8] sm:$0xff]   ;;  %v1297_v11 = vld [vmem:[#allocation3 + $0x158] sm:$0xff]   ;;  %v1298_v12 = vld [vmem:[#allocation3 + $0x1e0] sm:$0xff]   ;;  %52 = vst [vmem:[#allocation2 + $0x1] sm:$0x1] %v1404_v29 }
  0x2d   :  { %843 = vperm.xlu0 %1249, %v836_v21   ;;  %1130 = vmatprep.subr.bf16.mxu0 %v1265_v30  ;;  %v1296_v10 = vld [vmem:[#allocation3 + $0x1a8] sm:$0xff]   ;;  %v1299_v13 = vld [vmem:[#allocation3 + $0x118] sm:$0xff]   ;;  %v1300_v14 = vld [vmem:[#allocation3 + $0x1a0] sm:$0xff]   ;;  %53 = vst [vmem:[#allocation2 + $0x2] sm:$0x1] %v1404_v29 }
  0x2e   :  { %1151 = vmatpush3.bf16.msra.mxu1 %v1268_v33  ;;  %v1301_v15 = vld [vmem:[#allocation3 + $0x150] sm:$0xff]   ;;  %v1302_v16 = vld [vmem:[#allocation3 + $0x1d8] sm:$0xff]   ;;  %v1305_v19 = vld [vmem:[#allocation3 + $0x148] sm:$0xff]   ;;  %54 = vst [vmem:[#allocation2 + $0x3] sm:$0x1] %v1404_v29 }
  0x2f   :  { %1152 = vmatprep.subr.bf16.mxu1 %v1270_v35  ;;  %v1303_v17 = vld [vmem:[#allocation3 + $0x110] sm:$0xff]   ;;  %v1304_v18 = vld [vmem:[#allocation3 + $0x198] sm:$0xff]   ;;  %v1307_v21 = vld [vmem:[#allocation3 + $0x108] sm:$0xff]  }
  0x30   :  { %1131 = vmatpush3.bf16.msra.mxu0 %v1267_v32  ;;  %v1306_v20 = vld [vmem:[#allocation3 + $0x1d0] sm:$0xff]   ;;  %v1309_v23 = vld [vmem:[#allocation3 + $0x140] sm:$0xff]   ;;  %v1310_v24 = vld [vmem:[#allocation3 + $0x1c8] sm:$0xff]  }
  0x31   :  { %1132 = vmatprep.subr.bf16.mxu0 %v1269_v34  ;;  %v1308_v22 = vld [vmem:[#allocation3 + $0x190] sm:$0xff]   ;;  %v1311_v25 = vld [vmem:[#allocation3 + $0x100] sm:$0xff]   ;;  %v1312_v26 = vld [vmem:[#allocation3 + $0x188] sm:$0xff]  }
  0x32   :  { %1153 = vmatpush3.bf16.msra.mxu1 %v1272_v37  ;;  %v1313_v27 = vld [vmem:[#allocation3 + $0x1c0] sm:$0xff]   ;;  %v1315_v30 = vld [vmem:[#allocation6 + $0x38] sm:$0xff]   ;;  %v1316_v31 = vld [vmem:[#allocation6 + $0x30] sm:$0xff]  }
  0x33   :  { %1154 = vmatprep.subr.bf16.mxu1 %v1274_v39  ;;  %v1314_v28 = vld [vmem:[#allocation3 + $0x180] sm:$0xff]   ;;  %v1317_v32 = vld [vmem:[#allocation6 + $0x28] sm:$0xff]   ;;  %v1319_v34 = vld [vmem:[#allocation6 + $0x18] sm:$0xff]   ;;  %v851_v39 = vsub.s32 1, %v1439_v4 }
  0x34   :  { %1133 = vmatpush3.bf16.msra.mxu0 %v1271_v36  ;;  %v1318_v33 = vld [vmem:[#allocation6 + $0x20] sm:$0xff]   ;;  %v1320_v35 = vld [vmem:[#allocation6 + $0x10] sm:$0xff]   ;;  %v1321_v36 = vld [vmem:[#allocation6 + $0x8] sm:$0xff]  }
  0x35   :  { %1134 = vmatprep.subr.bf16.mxu0 %v1273_v38  ;;  %v1322_v37 = vld [vmem:[#allocation6] sm:$0xff]  }
  0x36   :  { %1155 = vmatpush3.bf16.msra.mxu1 %v1276_v41 }
  0x37   :  { %1156 = vmatprep.subr.bf16.mxu1 %v1278_v43  ;;  %v147_v43 = vld [vmem:[#allocation2] sm:$0x1] }
  0x38   :  { %1135 = vmatpush3.bf16.msra.mxu0 %v1275_v40 }
  0x39   :  { %1136 = vmatprep.subr.bf16.mxu0 %v1277_v42 }
  0x3a   :  { %1157 = vmatpush3.bf16.msra.mxu1 %v1280_v45 }
  0x3b   :  { %1158 = vmatprep.subr.bf16.mxu1 %v1281_v46 }
  0x3c   :  { %1137 = vmatpush3.bf16.msra.mxu0 %v1279_v44 }
  0x3d   :  { %1166 = vmatprep.subr.bf16.mxu0 %v1282_v47 }
  0x3e   :  { %1159 = vmatpush3.bf16.msra.mxu1 %v1283_v48 }
  0x3f   :  { %1188 = vmatprep.subr.bf16.mxu1 %v1286_v49 }
  0xa0   :  { %v89_v53 = vpop.permute.xlu0 %88 }
  0xa1   :  { %v93_v54 = vrot.slane %v89_v53, %v1452_v51 }
  0xa2   :  { %v103_v55 = vpop.permute.xlu1 %102 }
  0xa3   :  { %vm115_vm0 = vcmp.lt.s32.totalorder %v1449_v50, %v93_v54  ;;  %vm116_vm1 = vcmp.lt.s32.totalorder %v58_v52, %v93_v54  ;;  %v1458_v56 = vrot.slane %v103_v55, %v1452_v51 }
  0xa4   :  { %vm1051_vm2 = vmpackc.low %vm115_vm0, %vm115_vm0  ;;  %v96_v57 = vpop.permute.xlu0 %95  ;;  %vm1405_vm0 = vmmov 0  }
  0xa5   :  { %v100_v59 = vrot.slane %v96_v57, %v1452_v51  ;;  %vm1049_vm3 = vmpackc.low %vm116_vm1, %vm116_vm1  ;;  %vm119_vm4 = vcmp.lt.s32.totalorder %v1449_v50, %v1458_v56  ;;  %vm120_vm5 = vcmp.lt.s32.totalorder %v58_v52, %v1458_v56  ;;  %vm909_vm1 = vcmask 1041409  }
  0xa6   :  { %1050 = vmatprep.mubr.msk.bf16.mxu0 %vm1049_vm3, %v1403_v61  ;;  %vm1089_vm6 = vmpackc.low %vm120_vm5, %vm120_vm5  ;;  %v110_v62 = vpop.permute.xlu1 %109  ;;  %vm915_vm3 = vcmask 1043459  }
  0xa7   :  { %vm117_vm7 = vcmp.lt.s32.totalorder %v1449_v50, %v100_v59  ;;  %1052 = vmatmul.mubr.msk.bf16.vlgmr.msra.gmra.mxu0 %vm1051_vm2, %v1403_v61  ;;  %vm118_vm8 = vcmp.lt.s32.totalorder %v58_v52, %v100_v59  ;;  %v1468_v63 = vrot.slane %v110_v62, %v1452_v51  ;;  %vm1091_vm14 = vmpackc.low %vm119_vm4, %vm119_vm4  ;;  %vm912_vm2 = vcmask 1042434  }
  0xa8   :  { %vm1071_vm9 = vmpackc.low %vm117_vm7, %vm117_vm7  ;;  %1167 = vmatpush3.bf16.msra.mxu0 %v1284_v58  ;;  %1090 = vmatprep.mubr.msk.bf16.mxu0 %vm1089_vm6, %v1403_v61  ;;  %v844_v38 = vpop.permute.xlu0 %843 }
  0xa9   :  { %vm1069_vm10 = vmpackc.low %vm118_vm8, %vm118_vm8  ;;  %1168 = vmatprep.subr.bf16.mxu0 %v1285_v60  ;;  %vm121_vm11 = vcmp.lt.s32.totalorder %v1449_v50, %v1468_v63  ;;  %vm122_vm12 = vcmp.lt.s32.totalorder %v58_v52, %v1468_v63  ;;  %v848_v40 = vrot.slane %v844_v38, %v1452_v51  ;;  %v852_v42 = vrot.slane %v844_v38, %v851_v39  ;;  %v148_v50 = vld [vmem:[#allocation2 + $0x1] sm:$0x1] }
  0xaa   :  { %1070 = vmatprep.mubr.msk.bf16.mxu1 %vm1069_vm10, %v1403_v61  ;;  %vm1109_vm13 = vmpackc.low %vm122_vm12, %vm122_vm12 }
  0xab   :  { %1072 = vmatmul.mubr.msk.bf16.vlgmr.msra.gmra.mxu1 %vm1071_vm9, %v1403_v61  ;;  %vm1111_vm15 = vmpackc.low %vm121_vm11, %vm121_vm11  ;;  %1323 = vrcp.f32 %v848_v40 }
  0xac   :  { %1169 = vmatpush3.bf16.msra.mxu0 %v1287_v0  ;;  %1189 = vmatpush3.bf16.msra.mxu1 %v1288_v1  ;;  %1325 = vrcp.f32 %v852_v42  ;;  %v855_v1 = vsub.s32 2, %v1439_v4 }
  0xad   :  { %1170 = vmatprep.subr.bf16.mxu0 %v1289_v2  ;;  %1190 = vmatprep.subr.bf16.mxu1 %v1290_v3 }
  0xae   :  { %1110 = vmatprep.mubr.msk.bf16.mxu1 %vm1109_vm13, %v1403_v61 }
  0xb0   :  { %1171 = vmatpush3.bf16.msra.mxu0 %v1291_v5  ;;  %1191 = vmatpush3.bf16.msra.mxu1 %v1292_v6  ;;  %v859_v6 = vsub.s32 3, %v1439_v4 }
  0xb1   :  { %1172 = vmatprep.subr.bf16.mxu0 %v1293_v7  ;;  %1192 = vmatprep.subr.bf16.mxu1 %v1294_v8  ;;  %v856_v7 = vrot.slane %v844_v38, %v855_v1 }
  0xb3   :  { %1327 = vrcp.f32 %v856_v7 }
  0xb4   :  { %1173 = vmatpush3.bf16.msra.mxu0 %v1295_v9  ;;  %1193 = vmatpush3.bf16.msra.mxu1 %v1296_v10  ;;  %v860_v9 = vrot.slane %v844_v38, %v859_v6  ;;  %v149_v10 = vld [vmem:[#allocation2 + $0x2] sm:$0x1] }
  0xb5   :  { %1174 = vmatprep.subr.bf16.mxu0 %v1297_v11  ;;  %1194 = vmatprep.subr.bf16.mxu1 %v1298_v12 }
  0xb6   :  { %1329 = vrcp.f32 %v860_v9 }
  0xb8   :  { %1175 = vmatpush3.bf16.msra.mxu0 %v1299_v13  ;;  %1195 = vmatpush3.bf16.msra.mxu1 %v1300_v14  ;;  %v1324_v57 = vpop.eup %1323 }
  0xb9   :  { %1176 = vmatprep.subr.bf16.mxu0 %v1301_v15  ;;  %1196 = vmatprep.subr.bf16.mxu1 %v1302_v16  ;;  %v1326_v59 = vpop.eup %1325 }
  0xbc   :  { %1177 = vmatpush3.bf16.msra.mxu0 %v1303_v17  ;;  %1197 = vmatpush3.bf16.msra.mxu1 %v1304_v18  ;;  %v150_v17 = vld [vmem:[#allocation2 + $0x3] sm:$0x1] }
  0xbd   :  { %1178 = vmatprep.subr.bf16.mxu0 %v1305_v19  ;;  %1198 = vmatprep.subr.bf16.mxu1 %v1306_v20 }
  0xc0   :  { %1179 = vmatpush3.bf16.msra.mxu0 %v1307_v21  ;;  %1199 = vmatpush3.bf16.msra.mxu1 %v1308_v22  ;;  %v1328_v4 = vpop.eup %1327 }
  0xc1   :  { %1180 = vmatprep.subr.bf16.mxu0 %v1309_v23  ;;  %1200 = vmatprep.subr.bf16.mxu1 %v1310_v24 }
  0xc4   :  { %1181 = vmatpush3.bf16.msra.mxu0 %v1311_v25  ;;  %1201 = vmatpush3.bf16.msra.mxu1 %v1312_v26  ;;  %v1330_v26 = vpop.eup %1329 }
  0xc5   :  { %1202 = vmatprep.subr.bf16.mxu1 %v1313_v27  ;;  %1219 = vmatprep.subr.bf16.mxu0 %v1404_v29 }
  0xc7   :  { %1092 = vmatmul.mubr.msk.bf16.vlgmr.msra.gmra.mxu0 %vm1091_vm14, %v1403_v61 }
  0xc8   :  { %1203 = vmatpush3.bf16.msra.mxu1 %v1314_v28  ;;  %1220 = vmatpush3.bf16.msra.mxu0 %v1315_v30 }
  0xc9   :  { %1221 = vmatprep.subr.bf16.mxu0 %v1404_v29  ;;  %1235 = vmatprep.mubr.msk.bf16.mxu0 %vm1405_vm0, %v1404_v29 }
  0xcb   :  { %1112 = vmatmul.mubr.msk.bf16.vlgmr.msra.gmra.mxu1 %vm1111_vm15, %v1403_v61 }
  0xcc   :  { %1222 = vmatpush3.bf16.msra.mxu0 %v1316_v31 }
  0xcd   :  { %1223 = vmatprep.subr.bf16.mxu0 %v1404_v29 }
  0xd0   :  { %1224 = vmatpush3.bf16.msra.mxu0 %v1317_v32 }
  0xd1   :  { %1225 = vmatprep.subr.bf16.mxu0 %v1404_v29 }
  0xd4   :  { %1226 = vmatpush3.bf16.msra.mxu0 %v1318_v33 }
  0xd5   :  { %1227 = vmatprep.subr.bf16.mxu0 %v1404_v29 }
  0xd8   :  { %1228 = vmatpush3.bf16.msra.mxu0 %v1319_v34 }
  0xd9   :  { %1229 = vmatprep.subr.bf16.mxu0 %v1404_v29 }
  0xdc   :  { %1230 = vmatpush3.bf16.msra.mxu0 %v1320_v35 }
  0xdd   :  { %1231 = vmatprep.subr.bf16.mxu0 %v1404_v29 }
  0xe0   :  { %1232 = vmatpush3.bf16.msra.mxu0 %v1321_v36 }
  0xe1   :  { %1233 = vmatprep.subr.bf16.mxu0 %v1404_v29 }
  0xe4   :  { %1234 = vmatpush3.bf16.msra.mxu0 %v1322_v37  ;;  %v1113_v37 = vld [vmem:[%s1500_s3] ss:$0 sm:$0xff] }
 0x167   :  { %v1138_v41 = vpop.f32.mrf.mxu0 }
 0x169   :  { %v1139_v44 = vpop.f32.mrf.mxu0 }
 0x16a   :  { %v1140_v45 = vadd.f32 %v1139_v44, %v1138_v41 }
 0x16b   :  { %v1141_v46 = vpop.f32.mrf.mxu0  ;;  %v1160_v47 = vpop.f32.mrf.mxu1 }
 0x16c   :  { %v823_v48 = vadd.f32 %v1140_v45, %v147_v43 }
 0x16d   :  { %v1142_v49 = vpop.f32.mrf.mxu0  ;;  %v1161_v52 = vpop.f32.mrf.mxu1 }
 0x16e   :  { %827 = vst [vmem:[#allocation2] sm:$0x1] %v823_v48  ;;  %v1162_v53 = vadd.f32 %v1161_v52, %v1160_v47 }
 0x16f   :  { %v1163_v54 = vpop.f32.mrf.mxu1 }
 0x170   :  { %v824_v55 = vadd.f32 %v1162_v53, %v148_v50 }
 0x171   :  { %v1164_v56 = vpop.f32.mrf.mxu1 }
 0x172   :  { %828 = vst [vmem:[#allocation2 + $0x1] sm:$0x1] %v824_v55 }
 0x175   :  { %v837_v51 = vld [vmem:[#allocation2] sm:$0x1] }
 0x176   :  { %v866_v58 = vmul.f32 %v1324_v57, %v837_v51 }
 0x178   :  { %v873_v62 = vpack.c.bf16 %v866_v58, %v866_v58 }
 0x179   :  { %v838_v60 = vld [vmem:[#allocation2 + $0x1] sm:$0x1] }
 0x17a   :  { %v868_v61 = vmul.f32 %v1326_v59, %v838_v60  ;;  %v904_v2 = vunpack.c.l.b16 %v873_v62 }
 0x17c   :  { %v874_v63 = vpack.c.bf16 %v868_v61, %v868_v61 }
 0x17e   :  { %v905_v0 = vunpack.c.l.b16 %v874_v63 }
 0x180   :  { %v908_v3 = vrot.slane %v905_v0, 7 }
 0x182   :  { %v910_v5 = vsel %vm909_vm1, %v908_v3, %v904_v2 }
 0x187   :  { %v1182_v8 = vpop.f32.mrf.mxu0 }
 0x189   :  { %v1183_v11 = vpop.f32.mrf.mxu0 }
 0x18a   :  { %v1184_v12 = vadd.f32 %v1183_v11, %v1182_v8 }
 0x18b   :  { %v1185_v13 = vpop.f32.mrf.mxu0  ;;  %v1204_v14 = vpop.f32.mrf.mxu1 }
 0x18c   :  { %v825_v15 = vadd.f32 %v1184_v12, %v149_v10 }
 0x18d   :  { %v1186_v16 = vpop.f32.mrf.mxu0  ;;  %v1205_v18 = vpop.f32.mrf.mxu1 }
 0x18e   :  { %829 = vst [vmem:[#allocation2 + $0x2] sm:$0x1] %v825_v15  ;;  %v1206_v19 = vadd.f32 %v1205_v18, %v1204_v14 }
 0x18f   :  { %v1207_v20 = vpop.f32.mrf.mxu1 }
 0x190   :  { %v826_v21 = vadd.f32 %v1206_v19, %v150_v17 }
 0x191   :  { %v1208_v22 = vpop.f32.mrf.mxu1 }
 0x192   :  { %830 = vst [vmem:[#allocation2 + $0x3] sm:$0x1] %v826_v21 }
 0x195   :  { %v839_v23 = vld [vmem:[#allocation2 + $0x2] sm:$0x1] }
 0x196   :  { %v870_v24 = vmul.f32 %v1328_v4, %v839_v23 }
 0x198   :  { %v875_v25 = vpack.c.bf16 %v870_v24, %v870_v24 }
 0x199   :  { %v840_v27 = vld [vmem:[#allocation2 + $0x3] sm:$0x1] }
 0x19a   :  { %v872_v28 = vmul.f32 %v1330_v26, %v840_v27  ;;  %v906_v29 = vunpack.c.l.b16 %v875_v25 }
 0x19c   :  { %v876_v30 = vpack.c.bf16 %v872_v28, %v872_v28  ;;  %v911_v31 = vrot.slane %v906_v29, 6 }
 0x19e   :  { %v907_v32 = vunpack.c.l.b16 %v876_v30  ;;  %v913_v33 = vsel %vm912_vm2, %v911_v31, %v910_v5 }
 0x1a0   :  { %v914_v34 = vrot.slane %v907_v32, 5 }
 0x1a2   :  { %v916_v35 = vsel %vm915_vm3, %v914_v34, %v913_v33 }
 0x1a3   :  { %v917_v36 = vpack.c.b16 %v916_v35, %v916_v35 }
 0x1a5   :  { %1236 = vmatmul.mubr.bf16.vlgmr.msra.gmra.mxu0 %v917_v36 }
 0x265   :  { %v1001_v38 = vpop.f32.mrf.mxu0 }
 0x266   :  { %v1002_v39 = vadd.f32 %v1113_v37, %v1001_v38 }
 0x267   :  { %v1237_v40 = vpop.f32.mrf.mxu0 }
 0x268   :  { %1007 = vst [vmem:[#allocation8] sm:$0xf] %v1002_v39 }
 0x269   :  { %v1004_v41 = vpop.f32.mrf.mxu0 }
 0x26a   :  { %1382 = shalt.err (!%p1379_p0)
}
 0x26b   :  { %1017 = dma.vmem_to_hbm [thread:$0]  %s1015_s5, 64, %s1501_s4, [#allocation5]   ;;  %v1238_v42 = vpop.f32.mrf.mxu0 }
 0x26c   :  { %1395 = dma.done.wait [#allocation5], 64  }
 0x26d   :  { %1396 = vsyncadd [#allocation5], 4294967232 }
 0x26e   :  { %1021 = vsyncpa [#allocation4], 1 }
 0x26f   :  { %1022 = vsyncpa [#allocation7], 1 }
 0x270   :  { %1023 = vsyncpa [#allocation5], 1 }

</bundles_post_ra>
